<compile_context>
chip_gen: v6e
topology: v6e:2x2x1
jax: 0.10.0
libtpu: 0.0.40
codegen_flags: <defaults>
</compile_context>

<pallas_src>
import functools
import math

import jax
import jax.numpy as jnp
from jax.experimental import pallas as pl
from jax.experimental.pallas import tpu as pltpu


def _round_up(v, m):
    return (v + m - 1) // m * m


def _sinblock_kernel(x_ref, sp0_ref, c1_ref, d1_ref, w0_ref, w1_ref, o_ref, *,
                     add_skip):
    # Shapes seen by the kernel (batch dim squeezed via BlockSpec None):
    #   x_ref  : (TN, Cin)     x.dtype   activation tile
    #   sp0_ref: (1, Cin)      f32       style0 fc + 1            (per batch)
    #   c1_ref : (1, Cout)     f32       demod0 * (style1 fc + 1) (folded)
    #   d1_ref : (1, Cout)     f32       demod1                   (per batch)
    #   w0_ref : (Cin, Cout)   compute   weights (VMEM-resident)
    #   w1_ref : (Cout, Cout)  compute   weights (VMEM-resident)
    x = x_ref[...]
    w0 = w0_ref[...]
    w1 = w1_ref[...]

    # ---- mod1: (x * (s0+1)) @ W0 ; demod0 is applied after the LeakyReLU,
    # folded into c1 (valid since lrelu(z*d) == lrelu(z)*d for d > 0). ----
    xs = (x.astype(jnp.float32) * sp0_ref[...]).astype(w0.dtype)
    h = jnp.dot(xs, w0, preferred_element_type=jnp.float32)
    h = jnp.where(h >= 0.0, h, 0.2 * h)

    # ---- mod2: (h * demod0 * (s1+1)) @ W1 * demod1 -> LeakyReLU ----
    hs = (h * c1_ref[...]).astype(w1.dtype)
    out = jnp.dot(hs, w1, preferred_element_type=jnp.float32) * d1_ref[...]
    out = jnp.where(out >= 0.0, out, 0.2 * out)

    if add_skip:  # fused residual (x tile already resident in VMEM)
        out = out + x.astype(jnp.float32)

    o_ref[...] = out.astype(o_ref.dtype)


def sinblock_forward(x, style0, style1, params, *, skip=False, eps=1e-8,
                     tile_n=1024, compute_dtype=jnp.bfloat16):
    """x: (B, N, in_dim); style0/style1: (B, style_dim)."""
    B, N, in_dim = x.shape
    out_dim = params["w1"].shape[-1]
    f32 = jnp.float32

    # ---- per-batch style path, hoisted out of the kernel (tiny, O(B*C)) ----
    sp0 = style0.astype(f32) @ params["wm0"].astype(f32).T + params["bm0"].astype(f32) + 1.0
    sp1 = style1.astype(f32) @ params["wm1"].astype(f32).T + params["bm1"].astype(f32) + 1.0
    w0f = params["w0"].astype(f32)
    w1f = params["w1"].astype(f32)
    d0 = jax.lax.rsqrt((sp0 * sp0) @ (w0f * w0f) + eps)      # (B, out_dim)
    d1 = jax.lax.rsqrt((sp1 * sp1) @ (w1f * w1f) + eps)      # (B, out_dim)
    c1 = d0 * sp1                                            # fold demod0 into (s1+1)

    sp0v = sp0.reshape(B, 1, in_dim)
    c1v = c1.reshape(B, 1, out_dim)
    d1v = d1.reshape(B, 1, out_dim)
    w0c = w0f.astype(compute_dtype)
    w1c = w1f.astype(compute_dtype)

    add_skip = bool(skip) and (out_dim == in_dim)

    # ---- N tiling: no padding; ragged last tile handled by the cdiv grid ----
    if N <= tile_n:
        tn = N                              # full-dim block: legal for any N
    else:
        tn = max(8, (tile_n // 8) * 8)      # multiple of 8 sublanes

    # ---- generation-aware VMEM budget (pipeline buffers + live temps) ----
    cin_v = _round_up(in_dim, 128)
    cout_v = _round_up(out_dim, 128)
    x_b = jnp.dtype(x.dtype).itemsize
    w_b = jnp.dtype(compute_dtype).itemsize

    def vmem_est(t):
        t = _round_up(t, 8)
        return int(2 * t * cin_v * x_b                         # x tiles (2-buf)
                   + 2 * t * cout_v * x_b                      # out tiles (2-buf)
                   + 2 * (cin_v + cout_v) * cout_v * w_b       # weights (<=2 buf)
                   + 6 * 8 * max(cin_v, cout_v) * 4            # style/demod vecs
                   + t * (cin_v * (x_b + w_b) + cout_v * (8 + w_b)))  # live temps

    try:
        cap = int(pltpu.get_tpu_info().vmem_capacity_bytes)
    except Exception:
        cap = 64 * 1024 * 1024              # conservative (v7x per-TC VMEM)
    budget = int(0.75 * cap)
    while vmem_est(tn) > budget and tn > 64:
        tn = max(64, _round_up(tn // 2, 8))
    n_tiles = -(-N // tn)                   # cdiv
    vmem_limit = int(min(max(2 * vmem_est(tn), 32 * 1024 * 1024), budget))

    # ---- grid: larger axis leads so megacore / dual-TC sharding splits it ----
    if n_tiles >= B:
        grid = (n_tiles, B)
        xmap = lambda n, b: (b, n, 0)
        vmap_ = lambda n, b: (b, 0, 0)
        wmap = lambda n, b: (0, 0)
    else:
        grid = (B, n_tiles)
        xmap = lambda b, n: (b, n, 0)
        vmap_ = lambda b, n: (b, 0, 0)
        wmap = lambda b, n: (0, 0)

    kernel = functools.partial(_sinblock_kernel, add_skip=add_skip)

    def run(weight_pipeline_mode):
        wkw = ({} if weight_pipeline_mode is None
               else {"pipeline_mode": weight_pipeline_mode})
        return pl.pallas_call(
            kernel,
            out_shape=jax.ShapeDtypeStruct((B, N, out_dim), x.dtype),
            grid_spec=pltpu.PrefetchScalarGridSpec(
                num_scalar_prefetch=0,
                grid=grid,
                in_specs=[
                    pl.BlockSpec((None, tn, in_dim), xmap),        # x tile (native dtype)
                    pl.BlockSpec((None, 1, in_dim), vmap_),        # style0 + 1
                    pl.BlockSpec((None, 1, out_dim), vmap_),       # demod0*(style1+1)
                    pl.BlockSpec((None, 1, out_dim), vmap_),       # demod1
                    pl.BlockSpec((in_dim, out_dim), wmap, **wkw),  # w0 (resident)
                    pl.BlockSpec((out_dim, out_dim), wmap, **wkw), # w1 (resident)
                ],
                out_specs=pl.BlockSpec((None, tn, out_dim), xmap),
            ),
            compiler_params=pltpu.CompilerParams(
                dimension_semantics=("parallel", "parallel"),
                vmem_limit_bytes=vmem_limit),
        )(x, sp0v, c1v, d1v, w0c, w1c)

    try:
        out = run(pl.Buffered(1))   # weights single-buffered (constant index_map)
    except Exception:
        out = run(None)             # fallback: default pipeline buffering

    return out


# ----------------------- pure-JAX reference (torch semantics) -----------------
def _mod_ref(x, style, wmod, bmod, weight, eps=1e-8):
    # x: (B,N,in_c), style: (B,style_dim), weight: (in_c, out_c)
    style = style @ wmod.T + bmod                         # Linear -> (B, in_c)
    style = style[:, :, None]                             # (B, in_c, 1)
    w = weight[None] * (style + 1.0)                      # (B, in_c, out_c)
    demod = jax.lax.rsqrt(jnp.sum(w * w, axis=1) + eps)   # (B, out_c)
    w = w * demod[:, None, :]
    return jnp.einsum("bnc,bco->bno", x, w)


def sinblock_ref(x, style0, style1, params, *, skip=False):
    def lrelu(v):
        return jnp.where(v >= 0, v, 0.2 * v)
    h = lrelu(_mod_ref(x, style0, params["wm0"], params["bm0"], params["w0"]))
    out = lrelu(_mod_ref(h, style1, params["wm1"], params["bm1"], params["w1"]))
    if skip and out.shape[-1] == x.shape[-1]:
        out = out + x
    return out


# ----------------------- deterministic parameter init -------------------------
def init_params(key, in_dim, out_dim, style_dim):
    def kaiming_std(fan_in, a=0.2):
        gain = math.sqrt(2.0 / (1.0 + a * a))
        return gain / math.sqrt(fan_in)

    ks = jax.random.split(key, 6)
    # SinStyleMod.weight[0]: (in_c, out_c), kaiming fan_in=out_c (torch convention)
    w0 = jax.random.normal(ks[0], (in_dim, out_dim), jnp.float32) * kaiming_std(out_dim)
    w1 = jax.random.normal(ks[1], (out_dim, out_dim), jnp.float32) * kaiming_std(out_dim)
    # modulation Linear(style_dim, in_c): weight (in_c, style_dim), fan_in=style_dim
    wm0 = jax.random.normal(ks[2], (in_dim, style_dim), jnp.float32) * kaiming_std(style_dim)
    wm1 = jax.random.normal(ks[3], (out_dim, style_dim), jnp.float32) * kaiming_std(style_dim)
    bnd = 1.0 / math.sqrt(style_dim)
    bm0 = jax.random.uniform(ks[4], (in_dim,), jnp.float32, -bnd, bnd)
    bm1 = jax.random.uniform(ks[5], (out_dim,), jnp.float32, -bnd, bnd)
    return {"w0": w0, "w1": w1, "wm0": wm0, "bm0": bm0, "wm1": wm1, "bm1": bm1}


if __name__ == "__main__":
    root_key = jax.random.PRNGKey(0)

    def check(B, N, in_dim, out_dim, style_dim, *, skip, tile_n):
        k = jax.random.fold_in(root_key, B * 131 + N)
        kx, ks0, ks1, kp = jax.random.split(k, 4)
        x = jax.random.normal(kx, (B, N, in_dim), jnp.float32)
        s0 = jax.random.normal(ks0, (B, style_dim), jnp.float32)
        s1 = jax.random.normal(ks1, (B, style_dim), jnp.float32)
        params = init_params(kp, in_dim, out_dim, style_dim)
        ref = sinblock_ref(x, s0, s1, params, skip=skip)

        # f32 compute path: near bit-exact vs reference.
        out_f32 = jax.block_until_ready(
            sinblock_forward(x, s0, s1, params, skip=skip, tile_n=tile_n,
                             compute_dtype=jnp.float32))
        assert out_f32.shape == ref.shape
        assert jnp.allclose(out_f32, ref, atol=1e-4, rtol=1e-4), "f32 mismatch vs reference"

        # bf16 matmul path (default perf path): documented accuracy tradeoff.
        out_bf16 = jax.block_until_ready(
            sinblock_forward(x, s0, s1, params, skip=skip, tile_n=tile_n,
                             compute_dtype=jnp.bfloat16))
        assert out_bf16.shape == ref.shape
        assert jnp.allclose(out_bf16, ref, atol=5e-2, rtol=5e-2), "bf16 mismatch vs reference"

    # Small shapes consistent with SinBlock.forward (x: (B, N, in_dim)).
    check(2, 8, 32, 32, 16, skip=False, tile_n=1024)
    # Ragged N tiling (cdiv grid), B=1 (N-tile axis leads), fused residual skip.
    check(1, 1000, 64, 64, 16, skip=True, tile_n=256)

    print("KERNEL_OK")
</pallas_src>

<mosaic_0001>
module attributes {stable_mosaic.version = 11 : i64} {
  func.func @_sinblock_kernel(%arg0: i32, %arg1: i32, %arg2: memref<1x8x32xf32, #tpu.memory_space<vmem>>, %arg3: memref<1x1x32xf32, #tpu.memory_space<vmem>>, %arg4: memref<1x1x32xf32, #tpu.memory_space<vmem>>, %arg5: memref<1x1x32xf32, #tpu.memory_space<vmem>>, %arg6: memref<32x32xf32, #tpu.memory_space<vmem>>, %arg7: memref<32x32xf32, #tpu.memory_space<vmem>>, %arg8: memref<1x8x32xf32, #tpu.memory_space<vmem>>) attributes {dimension_semantics = [#tpu.dimension_semantics<parallel>, #tpu.dimension_semantics<parallel>], iteration_bounds = array<i64: 2, 1>, scalar_prefetch = 0 : i64, scratch_operands = 0 : i64, tpu.core_type = #tpu.core_type<tc>, window_params = [{transform_indices = @transform_0, window_bounds = array<i64: 1, 8, 32>}, {transform_indices = @transform_1, window_bounds = array<i64: 1, 1, 32>}, {transform_indices = @transform_2, window_bounds = array<i64: 1, 1, 32>}, {transform_indices = @transform_3, window_bounds = array<i64: 1, 1, 32>}, {pipeline_mode = #tpu.pipeline_mode<synchronous>, transform_indices = @transform_4, window_bounds = array<i64: 32, 32>}, {pipeline_mode = #tpu.pipeline_mode<synchronous>, transform_indices = @transform_5, window_bounds = array<i64: 32, 32>}, {transform_indices = @transform_6, window_bounds = array<i64: 1, 8, 32>}]} {
    %c0 = arith.constant 0 : index
    %c0_0 = arith.constant 0 : index
    %c0_1 = arith.constant 0 : index
    %0 = vector.load %arg2[%c0, %c0_0, %c0_1] : memref<1x8x32xf32, #tpu.memory_space<vmem>>, vector<1x8x32xf32>
    %1 = vector.shape_cast %0 : vector<1x8x32xf32> to vector<8x32xf32>
    %c0_2 = arith.constant 0 : index
    %c0_3 = arith.constant 0 : index
    %2 = vector.load %arg6[%c0_2, %c0_3] : memref<32x32xf32, #tpu.memory_space<vmem>>, vector<32x32xf32>
    %c0_4 = arith.constant 0 : index
    %c0_5 = arith.constant 0 : index
    %3 = vector.load %arg7[%c0_4, %c0_5] : memref<32x32xf32, #tpu.memory_space<vmem>>, vector<32x32xf32>
    %c0_6 = arith.constant 0 : index
    %c0_7 = arith.constant 0 : index
    %c0_8 = arith.constant 0 : index
    %4 = vector.load %arg3[%c0_6, %c0_7, %c0_8] : memref<1x1x32xf32, #tpu.memory_space<vmem>>, vector<1x1x32xf32>
    %5 = vector.shape_cast %4 : vector<1x1x32xf32> to vector<1x32xf32>
    %6 = vector.broadcast %5 : vector<1x32xf32> to vector<8x32xf32>
    %7 = arith.mulf %1, %6 : vector<8x32xf32>
    %cst = arith.constant dense<0.000000e+00> : vector<8x32xf32>
    %8 = tpu.matmul %7, %2, %cst {dimension_numbers = #tpu.dot_dimension_numbers<[1], [0], [0], [1], [0, 0, 1, 1], [], []>} : vector<8x32xf32>, vector<32x32xf32>, vector<8x32xf32> -> vector<8x32xf32>
    %cst_9 = arith.constant 0.000000e+00 : f32
    %9 = vector.broadcast %cst_9 : f32 to vector<8x32xf32>
    %10 = arith.cmpf oge, %8, %9 : vector<8x32xf32>
    %cst_10 = arith.constant 2.000000e-01 : f32
    %11 = vector.broadcast %cst_10 : f32 to vector<8x32xf32>
    %12 = arith.mulf %11, %8 : vector<8x32xf32>
    %13 = arith.select %10, %8, %12 : vector<8x32xi1>, vector<8x32xf32>
    %c0_11 = arith.constant 0 : index
    %c0_12 = arith.constant 0 : index
    %c0_13 = arith.constant 0 : index
    %14 = vector.load %arg4[%c0_11, %c0_12, %c0_13] : memref<1x1x32xf32, #tpu.memory_space<vmem>>, vector<1x1x32xf32>
    %15 = vector.shape_cast %14 : vector<1x1x32xf32> to vector<1x32xf32>
    %16 = vector.broadcast %15 : vector<1x32xf32> to vector<8x32xf32>
    %17 = arith.mulf %13, %16 : vector<8x32xf32>
    %cst_14 = arith.constant dense<0.000000e+00> : vector<8x32xf32>
    %18 = tpu.matmul %17, %3, %cst_14 {dimension_numbers = #tpu.dot_dimension_numbers<[1], [0], [0], [1], [0, 0, 1, 1], [], []>} : vector<8x32xf32>, vector<32x32xf32>, vector<8x32xf32> -> vector<8x32xf32>
    %c0_15 = arith.constant 0 : index
    %c0_16 = arith.constant 0 : index
    %c0_17 = arith.constant 0 : index
    %19 = vector.load %arg5[%c0_15, %c0_16, %c0_17] : memref<1x1x32xf32, #tpu.memory_space<vmem>>, vector<1x1x32xf32>
    %20 = vector.shape_cast %19 : vector<1x1x32xf32> to vector<1x32xf32>
    %21 = vector.broadcast %20 : vector<1x32xf32> to vector<8x32xf32>
    %22 = arith.mulf %18, %21 : vector<8x32xf32>
    %cst_18 = arith.constant 0.000000e+00 : f32
    %23 = vector.broadcast %cst_18 : f32 to vector<8x32xf32>
    %24 = arith.cmpf oge, %22, %23 : vector<8x32xf32>
    %cst_19 = arith.constant 2.000000e-01 : f32
    %25 = vector.broadcast %cst_19 : f32 to vector<8x32xf32>
    %26 = arith.mulf %25, %22 : vector<8x32xf32>
    %27 = arith.select %24, %22, %26 : vector<8x32xi1>, vector<8x32xf32>
    %c0_20 = arith.constant 0 : index
    %c0_21 = arith.constant 0 : index
    %c0_22 = arith.constant 0 : index
    %28 = vector.load %arg8[%c0_20, %c0_21, %c0_22] : memref<1x8x32xf32, #tpu.memory_space<vmem>>, vector<1x8x32xf32>
    %29 = vector.shape_cast %28 : vector<1x8x32xf32> to vector<8x32xf32>
    %30 = vector.shape_cast %27 : vector<8x32xf32> to vector<1x8x32xf32>
    tpu.vector_store %arg8[%c0_20, %c0_21, %c0_22], %30 {strides = array<i32>} : memref<1x8x32xf32, #tpu.memory_space<vmem>>, vector<1x8x32xf32>,
    return
  }
  func.func @transform_0(%arg0: i32, %arg1: i32) -> (i32, i32, i32) {
    %c0_i32 = arith.constant 0 : i32
    %c0_i32_0 = arith.constant 0 : i32
    return %arg0, %arg1, %c0_i32 : i32, i32, i32
  }
  func.func @transform_1(%arg0: i32, %arg1: i32) -> (i32, i32, i32) {
    %c0_i32 = arith.constant 0 : i32
    %c0_i32_0 = arith.constant 0 : i32
    %c0_i32_1 = arith.constant 0 : i32
    return %arg0, %c0_i32, %c0_i32_0 : i32, i32, i32
  }
  func.func @transform_2(%arg0: i32, %arg1: i32) -> (i32, i32, i32) {
    %c0_i32 = arith.constant 0 : i32
    %c0_i32_0 = arith.constant 0 : i32
    %c0_i32_1 = arith.constant 0 : i32
    return %arg0, %c0_i32, %c0_i32_0 : i32, i32, i32
  }
  func.func @transform_3(%arg0: i32, %arg1: i32) -> (i32, i32, i32) {
    %c0_i32 = arith.constant 0 : i32
    %c0_i32_0 = arith.constant 0 : i32
    %c0_i32_1 = arith.constant 0 : i32
    return %arg0, %c0_i32, %c0_i32_0 : i32, i32, i32
  }
  func.func @transform_4(%arg0: i32, %arg1: i32) -> (i32, i32) {
    %c0_i32 = arith.constant 0 : i32
    %c0_i32_0 = arith.constant 0 : i32
    %c0_i32_1 = arith.constant 0 : i32
    return %c0_i32, %c0_i32_0 : i32, i32
  }
  func.func @transform_5(%arg0: i32, %arg1: i32) -> (i32, i32) {
    %c0_i32 = arith.constant 0 : i32
    %c0_i32_0 = arith.constant 0 : i32
    %c0_i32_1 = arith.constant 0 : i32
    return %c0_i32, %c0_i32_0 : i32, i32
  }
  func.func @transform_6(%arg0: i32, %arg1: i32) -> (i32, i32, i32) {
    %c0_i32 = arith.constant 0 : i32
    %c0_i32_0 = arith.constant 0 : i32
    return %arg0, %arg1, %c0_i32 : i32, i32, i32
  }
}

module attributes {stable_mosaic.version = 11 : i64} {
  func.func @_sinblock_kernel(%arg0: i32, %arg1: i32, %arg2: memref<1x8x32xf32, #tpu.memory_space<vmem>>, %arg3: memref<1x1x32xf32, #tpu.memory_space<vmem>>, %arg4: memref<1x1x32xf32, #tpu.memory_space<vmem>>, %arg5: memref<1x1x32xf32, #tpu.memory_space<vmem>>, %arg6: memref<32x32xf32, #tpu.memory_space<vmem>>, %arg7: memref<32x32xf32, #tpu.memory_space<vmem>>, %arg8: memref<1x8x32xf32, #tpu.memory_space<vmem>>) attributes {dimension_semantics = [#tpu.dimension_semantics<parallel>, #tpu.dimension_semantics<parallel>], iteration_bounds = array<i64: 2, 1>, scalar_prefetch = 0 : i64, scratch_operands = 0 : i64, tpu.core_type = #tpu.core_type<tc>, window_params = [{transform_indices = @transform_0, window_bounds = array<i64: 1, 8, 32>}, {transform_indices = @transform_1, window_bounds = array<i64: 1, 1, 32>}, {transform_indices = @transform_2, window_bounds = array<i64: 1, 1, 32>}, {transform_indices = @transform_3, window_bounds = array<i64: 1, 1, 32>}, {pipeline_mode = #tpu.pipeline_mode<synchronous>, transform_indices = @transform_4, window_bounds = array<i64: 32, 32>}, {pipeline_mode = #tpu.pipeline_mode<synchronous>, transform_indices = @transform_5, window_bounds = array<i64: 32, 32>}, {transform_indices = @transform_6, window_bounds = array<i64: 1, 8, 32>}]} {
    %c0 = arith.constant 0 : index
    %c0_0 = arith.constant 0 : index
    %c0_1 = arith.constant 0 : index
    %0 = vector.load %arg2[%c0, %c0_0, %c0_1] : memref<1x8x32xf32, #tpu.memory_space<vmem>>, vector<1x8x32xf32>
    %1 = vector.shape_cast %0 : vector<1x8x32xf32> to vector<8x32xf32>
    %c0_2 = arith.constant 0 : index
    %c0_3 = arith.constant 0 : index
    %2 = vector.load %arg6[%c0_2, %c0_3] : memref<32x32xf32, #tpu.memory_space<vmem>>, vector<32x32xf32>
    %c0_4 = arith.constant 0 : index
    %c0_5 = arith.constant 0 : index
    %3 = vector.load %arg7[%c0_4, %c0_5] : memref<32x32xf32, #tpu.memory_space<vmem>>, vector<32x32xf32>
    %c0_6 = arith.constant 0 : index
    %c0_7 = arith.constant 0 : index
    %c0_8 = arith.constant 0 : index
    %4 = vector.load %arg3[%c0_6, %c0_7, %c0_8] : memref<1x1x32xf32, #tpu.memory_space<vmem>>, vector<1x1x32xf32>
    %5 = vector.shape_cast %4 : vector<1x1x32xf32> to vector<1x32xf32>
    %6 = vector.broadcast %5 : vector<1x32xf32> to vector<8x32xf32>
    %7 = arith.mulf %1, %6 : vector<8x32xf32>
    %cst = arith.constant dense<0.000000e+00> : vector<8x32xf32>
    %8 = tpu.matmul %7, %2, %cst {dimension_numbers = #tpu.dot_dimension_numbers<[1], [0], [0], [1], [0, 0, 1, 1], [], []>} : vector<8x32xf32>, vector<32x32xf32>, vector<8x32xf32> -> vector<8x32xf32>
    %cst_9 = arith.constant 0.000000e+00 : f32
    %9 = vector.broadcast %cst_9 : f32 to vector<8x32xf32>
    %10 = arith.cmpf oge, %8, %9 : vector<8x32xf32>
    %cst_10 = arith.constant 2.000000e-01 : f32
    %11 = vector.broadcast %cst_10 : f32 to vector<8x32xf32>
    %12 = arith.mulf %11, %8 : vector<8x32xf32>
    %13 = arith.select %10, %8, %12 : vector<8x32xi1>, vector<8x32xf32>
    %c0_11 = arith.constant 0 : index
    %c0_12 = arith.constant 0 : index
    %c0_13 = arith.constant 0 : index
    %14 = vector.load %arg4[%c0_11, %c0_12, %c0_13] : memref<1x1x32xf32, #tpu.memory_space<vmem>>, vector<1x1x32xf32>
    %15 = vector.shape_cast %14 : vector<1x1x32xf32> to vector<1x32xf32>
    %16 = vector.broadcast %15 : vector<1x32xf32> to vector<8x32xf32>
    %17 = arith.mulf %13, %16 : vector<8x32xf32>
    %cst_14 = arith.constant dense<0.000000e+00> : vector<8x32xf32>
    %18 = tpu.matmul %17, %3, %cst_14 {dimension_numbers = #tpu.dot_dimension_numbers<[1], [0], [0], [1], [0, 0, 1, 1], [], []>} : vector<8x32xf32>, vector<32x32xf32>, vector<8x32xf32> -> vector<8x32xf32>
    %c0_15 = arith.constant 0 : index
    %c0_16 = arith.constant 0 : index
    %c0_17 = arith.constant 0 : index
    %19 = vector.load %arg5[%c0_15, %c0_16, %c0_17] : memref<1x1x32xf32, #tpu.memory_space<vmem>>, vector<1x1x32xf32>
    %20 = vector.shape_cast %19 : vector<1x1x32xf32> to vector<1x32xf32>
    %21 = vector.broadcast %20 : vector<1x32xf32> to vector<8x32xf32>
    %22 = arith.mulf %18, %21 : vector<8x32xf32>
    %cst_18 = arith.constant 0.000000e+00 : f32
    %23 = vector.broadcast %cst_18 : f32 to vector<8x32xf32>
    %24 = arith.cmpf oge, %22, %23 : vector<8x32xf32>
    %cst_19 = arith.constant 2.000000e-01 : f32
    %25 = vector.broadcast %cst_19 : f32 to vector<8x32xf32>
    %26 = arith.mulf %25, %22 : vector<8x32xf32>
    %27 = arith.select %24, %22, %26 : vector<8x32xi1>, vector<8x32xf32>
    %c0_20 = arith.constant 0 : index
    %c0_21 = arith.constant 0 : index
    %c0_22 = arith.constant 0 : index
    %28 = vector.load %arg8[%c0_20, %c0_21, %c0_22] : memref<1x8x32xf32, #tpu.memory_space<vmem>>, vector<1x8x32xf32>
    %29 = vector.shape_cast %28 : vector<1x8x32xf32> to vector<8x32xf32>
    %30 = vector.shape_cast %27 : vector<8x32xf32> to vector<1x8x32xf32>
    tpu.vector_store %arg8[%c0_20, %c0_21, %c0_22], %30 {strides = array<i32>} : memref<1x8x32xf32, #tpu.memory_space<vmem>>, vector<1x8x32xf32>,
    return
  }
  func.func @transform_0(%arg0: i32, %arg1: i32) -> (i32, i32, i32) {
    %c0_i32 = arith.constant 0 : i32
    %c0_i32_0 = arith.constant 0 : i32
    return %arg0, %arg1, %c0_i32 : i32, i32, i32
  }
  func.func @transform_1(%arg0: i32, %arg1: i32) -> (i32, i32, i32) {
    %c0_i32 = arith.constant 0 : i32
    %c0_i32_0 = arith.constant 0 : i32
    %c0_i32_1 = arith.constant 0 : i32
    return %arg0, %c0_i32, %c0_i32_0 : i32, i32, i32
  }
  func.func @transform_2(%arg0: i32, %arg1: i32) -> (i32, i32, i32) {
    %c0_i32 = arith.constant 0 : i32
    %c0_i32_0 = arith.constant 0 : i32
    %c0_i32_1 = arith.constant 0 : i32
    return %arg0, %c0_i32, %c0_i32_0 : i32, i32, i32
  }
  func.func @transform_3(%arg0: i32, %arg1: i32) -> (i32, i32, i32) {
    %c0_i32 = arith.constant 0 : i32
    %c0_i32_0 = arith.constant 0 : i32
    %c0_i32_1 = arith.constant 0 : i32
    return %arg0, %c0_i32, %c0_i32_0 : i32, i32, i32
  }
  func.func @transform_4(%arg0: i32, %arg1: i32) -> (i32, i32) {
    %c0_i32 = arith.constant 0 : i32
    %c0_i32_0 = arith.constant 0 : i32
    %c0_i32_1 = arith.constant 0 : i32
    return %c0_i32, %c0_i32_0 : i32, i32
  }
  func.func @transform_5(%arg0: i32, %arg1: i32) -> (i32, i32) {
    %c0_i32 = arith.constant 0 : i32
    %c0_i32_0 = arith.constant 0 : i32
    %c0_i32_1 = arith.constant 0 : i32
    return %c0_i32, %c0_i32_0 : i32, i32
  }
  func.func @transform_6(%arg0: i32, %arg1: i32) -> (i32, i32, i32) {
    %c0_i32 = arith.constant 0 : i32
    %c0_i32_0 = arith.constant 0 : i32
    return %arg0, %arg1, %c0_i32 : i32, i32, i32
  }
}

</mosaic_0001>

<bundles_post_ra>
// kernel: tpu_custom_call.1
= control target key start
LH: loop header
LB: loop body
LE: loop exit
PB: predicated region body
PF: predicated region fallthrough
CT: control target
= control target key end

     0   :  { %s1326_s0 = inlined_call_operand.hbm [shape: f32[2,8,32], index: 0, kind: input, shape index: {}]   ;;  %s1327_s1 = inlined_call_operand.hbm [shape: f32[2,1,32], index: 1, kind: input, shape index: {}]   ;;  %s1328_s2 = inlined_call_operand.vmem [shape: f32[2,1,32], index: 2, kind: input, shape index: {}]   ;;  %s1329_s3 = inlined_call_operand.vmem [shape: f32[2,1,32], index: 3, kind: input, shape index: {}]   ;;  %s1330_s4 = inlined_call_operand.hbm [shape: f32[32,32], index: 4, kind: input, shape index: {}]   ;;  %s1331_s5 = inlined_call_operand.hbm [shape: f32[32,32], index: 5, kind: input, shape index: {}]   ;;  %s1332_s6 = inlined_call_operand.hbm [shape: f32[2,8,32], index: 6, kind: output, shape index: {}]  }
   0x1   :  { %1336 = sst [smem:[#allocation19_spill]] %s1326_s0 }
   0x2   :  { %1337 = sst [smem:[#allocation20_spill]] %s1330_s4 }
   0x3   :  { %1338 = sst [smem:[#allocation21_spill]] %s1331_s5 }
   0x4   :  { %11 = vsyncpa [#allocation3], 0 }
   0x5   :  { %13 = vsyncpa [#allocation3 + $0x1], 0 }
   0x6   :  { %14 = vsyncpa [#allocation6], 0 }
   0x7   :  { %16 = vsyncpa [#allocation6 + $0x1], 0 }
   0x8   :  { %17 = vsyncpa [#allocation9], 0 }
   0x9   :  { %18 = vsyncpa [#allocation4], 0 }
   0xa   :  { %20 = vsyncpa [#allocation4 + $0x1], 0  ;;  %s1107_s21 = smov 0   ;;  %s1109_s22 = smov 0  }
   0xb   :  { %s1111_s23 = smov 0   ;;  %s1113_s24 = smov 0  }
   0xc   :  { %s1115_s25 = smov 0   ;;  %s1117_s26 = smov 0  }
   0xd LB: > { %1339 = sst [smem:[#allocation16_spill]] %s1049_s23  ;;  %s1138_s27 = sadd.s32 4294967295, %s1061_s26   ;;  %s1061_s26 = sphi %s1117_s26, %s26_s26   ;;  %s1057_s25 = sphi %s1115_s25, %s1364_s25   ;;  %s1053_s24 = sphi %s1113_s24, %s1363_s24   ;;  %s1049_s23 = sphi %s1111_s23, %s1359_s23   ;;  %s1045_s22 = sphi %s1109_s22, %s1362_s22   ;;  %s1041_s21 = sphi %s1107_s21, %s1361_s21  }
   0xe   : > { %s715_s28 = sadd.s32 4294967294, %s1061_s26   ;;  %p60_p0 = scmp.ne.s32.totalorder %s1045_s22, %s1041_s21 }
   0xf   : > { %p1333_p1 = scmp.eq.s32.totalorder %s1138_s27, 0  ;;  %p212_p3 = scmp.eq.s32.totalorder %s715_s28, 1 }
  0x10   : > { %p716_p5 = scmp.ge.s32.totalorder %s1061_s26, 1  ;;  %p219_p7 = scmp.lt.s32.totalorder %s1061_s26, 3 }
  0x11   : > { %p1147_p4 = por %p1333_p1, %p60_p0  ;;  %p1152_p6 = por %p212_p3, %p60_p0 }
  0x12   : > { %p1157_p8 = pnand %p716_p5, %p219_p7  ;;  %s1063_s8 = smov [#allocation7]  }
  0x13   : > { %s1341_s30 = scalar_select %p1152_p6, 1, 0 }
  0x14   : > { %s231_s9 = sshll.u32 %s1063_s8, 4  ;;  %p783_p9 = pneg %p1157_p8  ;;  %s232_s9 = int_to_ptr.vmem [resolvable:$true] %s231_s9 }
  0x15   : > { %s1064_s11 = smov [#allocation8]   ;;  %s872_s13 = scalar_lea.vmem %s232_s9, 512 }
  0x16   : > { %p1166_p11 = pnand %p783_p9, %p1333_p1  ;;  %s244_s12 = sshll.u32 %s1064_s11, 4  ;;  %s245_s12 = int_to_ptr.vmem [resolvable:$true] %s244_s12 }
  0x17   : > { %p873_p13 = scmp.ne.s32.totalorder %s232_s9, %s872_s13  ;;  %p880_p5 = scmp.lt.s32.totalorder %s232_s9, %s232_s9 }
  0x18   : > { %p863_p12 = pneg %p1166_p11  ;;  %p881_p7 = scmp.lt.s32.totalorder %s872_s13, %s872_s13 }
  0x1a   : > { %p875_p0 = pnand %p873_p13, %p863_p12  ;;  %p882_p10 = por %p881_p7, %p880_p5 }
  0x1c   : > { %p876_p3 = pneg %p875_p0 }
  0x1e   : > { %p883_p9 = pnand %p882_p10, %p876_p3 }
  0x20   : > { %886 = shalt.err (!%p883_p9)
}
  0x21   : > { %s1065_s14 = smov 128   ;;  %s1066_s15 = smov 8  }
  0x22   : > { %s1344_s4 = sld [smem:[#allocation20_spill]]  ;;  %s898_s18 = scalar_lea.vmem %s245_s12, 512 }
  0x23   : > { %p899_p1 = scmp.ne.s32.totalorder %s245_s12, %s898_s18  ;;  %p906_p2 = scmp.lt.s32.totalorder %s245_s12, %s245_s12 }
  0x24   : > { %p907_p6 = scmp.lt.s32.totalorder %s898_s18, %s898_s18 }
  0x25   : > { %p901_p13 = pnand %p899_p1, %p863_p12 }
  0x26   : > { %p908_p5 = por %p907_p6, %p906_p2 }
  0x27   : > { %p902_p0 = pneg %p901_p13 }
  0x28   : > { %786 = dma.hbm_to_vmem [thread:$0]  (!%p1166_p11), %s1344_s4, 512, %s232_s9, [#allocation6], %s1065_s14, %s1065_s14, %s1066_s15  }
  0x29   : > { %p909_p10 = pnand %p908_p5, %p902_p0 }
  0x2b   : > { %912 = shalt.err (!%p909_p10)
}
  0x2c   : > { %s1345_s5 = sld [smem:[#allocation21_spill]]  ;;  %s38_s28 = sadd.s32 1, %s1057_s25 }
  0x2d   : > { %s47_s8 = sadd.s32 1, %s1049_s23  ;;  %p40_p1 = scmp.ge.s32.totalorder %s38_s28, 2 }
  0x2e   : > { %p54_p2 = scmp.ne.s32.totalorder %s1049_s23, %s1045_s22  ;;  %p55_p6 = scmp.eq.s32.totalorder %s1061_s26, 0 }
  0x2f   : > { %p803_p12 = scmp.lt.s32.totalorder %s1061_s26, 2  ;;  %s1366_s28 = smov (%p40_p1, %s38_s28), 0 }
  0x30   : > { %1346 = sst [smem:[#allocation17_spill]] %s1366_s28  ;;  %p56_p3 = por %p55_p6, %p54_p2 }
  0x31   : > { %p1347_p7 = scmp.eq.s32.totalorder %s1138_s27, 1  ;;  %s42_s10 = ssub.s32 %s1057_s25, %s1366_s28 }
  0x32   : > { %789 = dma.hbm_to_vmem [thread:$0]  (!%p1166_p11), %s1345_s5, 512, %s245_s12, [#allocation9], %s1065_s14, %s1065_s14, %s1066_s15  }
  0x33   : > { %p1198_p9 = por %p1347_p7, %p54_p2  ;;  %s1205_s11 = sand.u32 1, %s1049_s23  }
  0x34   : > { %p45_p11 = scmp.eq.s32.totalorder %s42_s10, 0  ;;  %s720_s12 = sshll.u32 %s1205_s11, 3 }
  0x35   : > { %s721_s13 = sshll.u32 %s1057_s25, 7  ;;  %s1350_s0 = sld [smem:[#allocation19_spill]] }
  0x36   : > { %s1210_s14 = scalar_select %p45_p11, %s1049_s23, %s47_s8  }
  0x37   : > { %s262_s18 = scalar_lea.vmem [#allocation2], %s720_s12  ;;  %p1217_p13 = pnand %p803_p12, %p56_p3 }
  0x38   : > { %1349 = sst [smem:[#allocation18_spill]] %s1210_s14  ;;  %s270_s19 = sshll.u32 %s262_s18, 4  ;;  %s271_s19 = int_to_ptr.vmem [resolvable:$true] %s270_s19 }
  0x39   : > { %s277_s4 = sand.u32 1, %s1061_s26   ;;  %s259_s10 = scalar_lea.sflag [#allocation3], %s1205_s11 }
  0x3a   : > { %p915_p0 = pneg %p1217_p13  ;;  %s926_s8 = scalar_lea.vmem %s271_s19, 128 }
  0x3b   : > { %s268_s17 = scalar_lea.hbm %s1350_s0, %s721_s13  ;;  %p927_p5 = scmp.ne.s32.totalorder %s271_s19, %s926_s8 }
  0x3c   : > { %s1067_s12 = smov [#allocation2]  }
  0x3d   : > { %p929_p10 = pnand %p927_p5, %p915_p0  ;;  %s931_s13 = sshll.u32 %s1067_s12, 4  ;;  %s932_s13 = int_to_ptr.vmem [resolvable:$false] %s931_s13 }
  0x3e   : > { %s933_s15 = scalar_lea.vmem %s932_s13, 256  ;;  %p934_p2 = scmp.lt.s32.totalorder %s271_s19, %s932_s13 }
  0x3f   : > { %p930_p1 = pneg %p929_p10  ;;  %p935_p6 = scmp.lt.s32.totalorder %s933_s15, %s926_s8 }
  0x41   : > { %p936_p12 = por %p935_p6, %p934_p2 }
  0x43   : > { %p937_p3 = pnand %p936_p12, %p930_p1 }
  0x45   : > { %940 = shalt.err (!%p937_p3)
}
  0x46   : > { %793 = dma.hbm_to_vmem [thread:$0]  (!%p1217_p13), %s268_s17, 128, %s271_s19, %s259_s10  }
  0x47   : > { %s722_s16 = sshll.u32 %s1057_s25, 4  ;;  %s280_s28 = scalar_lea.vmem [#allocation5], %s1205_s11 }
  0x48   : > { %s285_s5 = scalar_lea.hbm %s1327_s1, %s722_s16  ;;  %s287_s12 = sshll.u32 %s280_s28, 4  ;;  %s288_s12 = int_to_ptr.vmem [resolvable:$true] %s287_s12 }
  0x49   : > { %s278_s14 = scalar_lea.sflag [#allocation6], %s277_s4  ;;  %s954_s13 = scalar_lea.vmem %s288_s12, 16 }
  0x4a   : > { %p955_p7 = scmp.ne.s32.totalorder %s288_s12, %s954_s13  ;;  %s1068_s8 = smov [#allocation5]  }
  0x4b   : > { %s959_s15 = sshll.u32 %s1068_s8, 4  ;;  %s960_s15 = int_to_ptr.vmem [resolvable:$false] %s959_s15 }
  0x4c   : > { %p957_p11 = pnand %p955_p7, %p915_p0  ;;  %s961_s23 = scalar_lea.vmem %s960_s15, 32 }
  0x4d   : > { %p962_p10 = scmp.lt.s32.totalorder %s288_s12, %s960_s15  ;;  %p963_p1 = scmp.lt.s32.totalorder %s961_s23, %s954_s13 }
  0x4e   : > { %p958_p5 = pneg %p957_p11 }
  0x4f   : > { %p964_p2 = por %p963_p1, %p962_p10 }
  0x51   : > { %p965_p6 = pnand %p964_p2, %p958_p5 }
  0x53   : > { %968 = shalt.err (!%p965_p6)
}
  0x54   : > { %796 = dma.hbm_to_vmem [thread:$0]  (!%p1217_p13), %s285_s5, 16, %s288_s12, %s278_s14  }
  0x55   : > { %308 = sbr.rel (%p1157_p8) target bundleno = 519 (0x207), region = 44  ;;  %s1243_s0 = sand.u32 (!%p1157_p8), 1, %s1045_s22  }
  0x56   : > { %s724_s4 = sshll.u32 (!%p1157_p8), %s1243_s0, 3  ;;  %s311_s28 = scalar_lea.sflag (!%p1157_p8), [#allocation3], %s1243_s0 }
  0x57   : > { %s314_s23 = scalar_lea.vmem (!%p1157_p8), [#allocation2], %s724_s4 }
  0x5a   : > { %1020 = dma.done.wait (%p1147_p4), %s311_s28, 128  }
  0x5b   : > { %1022 = vsyncadd (%p1147_p4), %s311_s28, 4294967168  ;;  %s319_s5 = sand.u32 1, %s1138_s27   ;;  %s322_s11 = scalar_lea.vmem [#allocation5], %s1243_s0 }
  0x5c   : > { %s320_s7 = scalar_lea.sflag [#allocation6], %s319_s5 }
  0x5d   : > { %1024 = dma.done.wait (%p1147_p4), %s320_s7, 16  }
  0x5e   : > { %1026 = vsyncadd (%p1147_p4), %s320_s7, 4294967280  ;;  %p1352_p8 = scmp.eq.s32.totalorder %s1138_s27, 0 }
  0x60   : > { %1028 = dma.done.wait (%p1352_p8), [#allocation6], 512   ;;  %p1353_p13 = pmov %p1352_p8 }
  0x61   : > { %p1354_p0 = pmov %p1352_p8 }
  0x62   : > { %1030 = vsyncadd (%p1353_p13), [#allocation6], 4294966784 }
  0x63   : > { %1032 = dma.done.wait (%p1354_p0), [#allocation9], 512   ;;  %p1355_p12 = pmov %p1354_p0 }
  0x64   : > { %v1069_v0 = vmov 0.0   ;;  %vm1070_vm0 = vmmov 0   ;;  %v379_v1 = vld [vmem:[#allocation7 + $0x18] sm:$0xff]  ;;  %v378_v2 = vld [vmem:[#allocation7 + $0x10] sm:$0xff]  ;;  %v728_v4 = vld [vmem:[%s322_s11] ss:$0 sm:$0xff] }
  0x65   : > { %1034 = vsyncadd (%p1355_p12), [#allocation9], 4294966784  ;;  %747 = vmatprep.subr.mxu0 %v1069_v0  ;;  %755 = vmatprep.mubr.msk.f32.mxu0 %vm1070_vm0, %v1069_v0  ;;  %v375_v3 = vld [vmem:[%s314_s23] sm:$0xff]  ;;  %v376_v7 = vld [vmem:[#allocation7] sm:$0xff]  ;;  %vm392_vm1 = vcmask 261120   ;;  %p369_p4 = scmp.lt.s32.totalorder %s1053_s24, 1 }
  0x66   : > { %758 = vmatprep.subr.mxu1 %v1069_v0  ;;  %766 = vmatprep.mubr.msk.f32.mxu1 %vm1070_vm0, %v1069_v0  ;;  %v377_v5 = vld [vmem:[#allocation7 + $0x8] sm:$0xff]  ;;  %v383_v6 = vld [vmem:[#allocation8 + $0x18] sm:$0xff]  ;;  %v391_v8 = vmul.f32 %v728_v4, %v375_v3  ;;  %v382_v9 = vld [vmem:[#allocation8 + $0x10] sm:$0xff]  ;;  %s734_s16 = sshll.u32 %s1053_s24, 7  ;;  %s368_s18 = scalar_lea.vmem [#allocation10], %s724_s4 }
  0x67   : > { %748 = vmatpush3.msra.mxu0 %v379_v1  ;;  %759 = vmatpush3.msra.mxu1 %v383_v6  ;;  %v381_v10 = vld [vmem:[#allocation8 + $0x8] sm:$0xff]  ;;  %v380_v11 = vld [vmem:[#allocation8] sm:$0xff]  ;;  %s370_s27 = scalar_select %p369_p4, %s1053_s24, 1 }
  0x68   : > { %749 = vmatprep.subr.mxu0 %v1069_v0  ;;  %760 = vmatprep.subr.mxu1 %v1069_v0  ;;  %s577_s12 = sshll.u32 %s368_s18, 4  ;;  %s1283_s15 = scalar_lea.hbm %s1332_s6, %s734_s16  ;;  %s578_s12 = int_to_ptr.vmem [resolvable:$true] %s577_s12 }
  0x69   : > { %750 = vmatpush3.msra.mxu0 %v378_v2  ;;  %761 = vmatpush3.msra.mxu1 %v382_v9  ;;  %s371_s17 = scalar_lea.vmem %s1328_s2, %s370_s27  ;;  %s374_s10 = scalar_lea.vmem %s1329_s3, %s370_s27 }
  0x6a   : > { %751 = vmatprep.subr.mxu0 %v1069_v0  ;;  %762 = vmatprep.subr.mxu1 %v1069_v0  ;;  %v730_v14 = vld [vmem:[%s371_s17] ss:$0 sm:$0xff]  ;;  %s563_s28 = scalar_lea.sflag [#allocation4], %s1243_s0  ;;  %s969_s23 = scalar_lea.vmem %s578_s12, 128 }
  0x6b   : > { %752 = vmatpush3.msra.mxu0 %v377_v5  ;;  %763 = vmatpush3.msra.mxu1 %v381_v10  ;;  %v732_v18 = vld [vmem:[%s374_s10] ss:$0 sm:$0xff]  ;;  %p970_p3 = scmp.ne.s32.totalorder %s578_s12, %s969_s23  ;;  %s1071_s24 = smov [#allocation10]  }
  0x6c   : > { %753 = vmatprep.subr.mxu0 %v1069_v0  ;;  %764 = vmatprep.subr.mxu1 %v1069_v0  ;;  %s973_s4 = sshll.u32 %s1071_s24, 4  ;;  %s974_s4 = int_to_ptr.vmem [resolvable:$false] %s973_s4 }
  0x6d   : > { %754 = vmatpush3.msra.mxu0 %v376_v7  ;;  %765 = vmatpush3.msra.mxu1 %v380_v11  ;;  %p971_p7 = pnand %p970_p3, %p1198_p9  ;;  %s975_s5 = scalar_lea.vmem %s974_s4, 256 }
  0x6e   : > { %756 = vmatmul.mubr.msk.f32.vlgmr.msra.gmra.mxu0 %vm392_vm1, %v391_v8  ;;  %p976_p5 = scmp.lt.s32.totalorder %s578_s12, %s974_s4  ;;  %p977_p10 = scmp.lt.s32.totalorder %s975_s5, %s969_s23 }
  0x6f   : > { %p972_p11 = pneg %p971_p7 }
  0x70   : > { %p978_p1 = por %p977_p10, %p976_p5 }
  0x72   : > { %p979_p2 = pnand %p978_p1, %p972_p11 }
 0x12e   : > { %v462_v12 = vpop.f32.mrf.mxu0 }
 0x12f   : > { %vm466_vm2 = vcmp.ge.f32.partialorder %v462_v12, 0.0  ;;  %v467_v13 = vmul.f32 0.2, %v462_v12 }
 0x130   : > { %v757_v15 = vpop.f32.mrf.mxu0 }
 0x131   : > { %v468_v16 = vsel %vm466_vm2, %v462_v12, %v467_v13 }
 0x132   : > { %v476_v17 = vmul.f32 %v730_v14, %v468_v16 }
 0x134   : > { %767 = vmatmul.mubr.msk.f32.vlgmr.msra.gmra.mxu1 %vm392_vm1, %v476_v17 }
 0x1f4   : > { %v546_v19 = vpop.f32.mrf.mxu1 }
 0x1f5   : > { %v557_v20 = vmul.f32 %v732_v18, %v546_v19 }
 0x1f6   : > { %v768_v21 = vpop.f32.mrf.mxu1 }
 0x1f7   : > { %vm558_vm3 = vcmp.ge.f32.partialorder %v557_v20, 0.0  ;;  %v559_v22 = vmul.f32 0.2, %v557_v20 }
 0x1f9   : > { %v560_v23 = vsel %vm558_vm3, %v557_v20, %v559_v22 }
 0x1fa   : > { %561 = vst.msk [vmem:[%s368_s18] sm:$0xff] %vm392_vm1, %v560_v23 }
 0x1fb   : > { %982 = shalt.err (!%p979_p2)
}
 0x1fc   : > { %s983_s7 = scalar_lea.hbm %s1283_s15, 128  ;;  %s987_s27 = scalar_lea.hbm %s1332_s6, 256 }
 0x1fd   : > { %p984_p6 = scmp.ne.s32.totalorder %s1283_s15, %s983_s7  ;;  %p988_p0 = scmp.lt.s32.totalorder %s1283_s15, %s1332_s6 }
 0x1fe   : > { %p989_p12 = scmp.lt.s32.totalorder %s987_s27, %s983_s7 }
 0x1ff   : > { %p985_p8 = pnand %p984_p6, %p1198_p9 }
 0x200   : > { %p990_p4 = por %p989_p12, %p988_p0 }
 0x201   : > { %p986_p13 = pneg %p985_p8 }
 0x203   : > { %p991_p3 = pnand %p990_p4, %p986_p13 }
 0x205   : > { %994 = shalt.err (!%p991_p3)
}
 0x206   : > { %781 = dma.vmem_to_hbm [thread:$0]  (%p1198_p9), %s578_s12, 128, %s1283_s15, %s563_s28  }
 0x207 PF: > { %s589_s17 = sand.u32 1, %s1041_s21   ;;  %p1356_p7 = scmp.ne.s32.totalorder %s1341_s30, 0 }
 0x208   : > { %p1357_p11 = scmp.ge.s32.totalorder %s1061_s26, 2  ;;  %s590_s19 = scalar_lea.sflag [#allocation4], %s589_s17 }
 0x20a   : > { %p798_p5 = pnand %p1357_p11, %p1356_p7 }
 0x20c   : > { %p799_p10 = pneg %p798_p5 }
 0x20e   : > { %1036 = dma.done.wait (%p799_p10), %s590_s19, 128  }
 0x20f   : > { %1038 = vsyncadd (%p799_p10), %s590_s19, 4294967168  ;;  %s26_s26 = sadd.s32 1, %s1061_s26   ;;  %s1358_s20 = sld [smem:[#allocation16_spill]] }
 0x210   : > { %p23_p1 = scmp.ge.s32.totalorder %s26_s26, 4   ;;  %s1359_s23 = sld [smem:[#allocation18_spill]] }
 0x211   : > { %s1360_s9 = sld [smem:[#allocation17_spill]]  ;;  %s1361_s21 = smov %s1045_s22 }
 0x212   : > { %s1363_s24 = smov %s1057_s25 }
 0x213   :  { %25 = sbr.rel (!%p23_p1) target bundleno = 13 (0xd), region = 116 }
 0x215   : > { %s1362_s22 = smov %s1358_s20 }
 0x217   : > { %s1364_s25 = smov %s1360_s9 }
 0x218   :  { %595 = vsyncpa [#allocation3], 1 }
 0x219   :  { %597 = vsyncpa [#allocation3 + $0x1], 1 }
 0x21a   :  { %598 = vsyncpa [#allocation6], 1 }
 0x21b   :  { %600 = vsyncpa [#allocation6 + $0x1], 1 }
 0x21c   :  { %601 = vsyncpa [#allocation9], 1 }
 0x21d   :  { %602 = vsyncpa [#allocation4], 1 }
 0x21e   :  { %604 = vsyncpa [#allocation4 + $0x1], 1 }

// kernel: tpu_custom_call.1
= control target key start
LH: loop header
LB: loop body
LE: loop exit
PB: predicated region body
PF: predicated region fallthrough
CT: control target
= control target key end

     0   :  { %s1326_s0 = inlined_call_operand.hbm [shape: f32[2,8,32], index: 0, kind: input, shape index: {}]   ;;  %s1327_s1 = inlined_call_operand.hbm [shape: f32[2,1,32], index: 1, kind: input, shape index: {}]   ;;  %s1328_s2 = inlined_call_operand.vmem [shape: f32[2,1,32], index: 2, kind: input, shape index: {}]   ;;  %s1329_s3 = inlined_call_operand.vmem [shape: f32[2,1,32], index: 3, kind: input, shape index: {}]   ;;  %s1330_s4 = inlined_call_operand.hbm [shape: f32[32,32], index: 4, kind: input, shape index: {}]   ;;  %s1331_s5 = inlined_call_operand.hbm [shape: f32[32,32], index: 5, kind: input, shape index: {}]   ;;  %s1332_s6 = inlined_call_operand.hbm [shape: f32[2,8,32], index: 6, kind: output, shape index: {}]  }
   0x1   :  { %1336 = sst [smem:[#allocation19_spill]] %s1326_s0 }
   0x2   :  { %1337 = sst [smem:[#allocation20_spill]] %s1330_s4 }
   0x3   :  { %1338 = sst [smem:[#allocation21_spill]] %s1331_s5 }
   0x4   :  { %11 = vsyncpa [#allocation3], 0 }
   0x5   :  { %13 = vsyncpa [#allocation3 + $0x1], 0 }
   0x6   :  { %14 = vsyncpa [#allocation6], 0 }
   0x7   :  { %16 = vsyncpa [#allocation6 + $0x1], 0 }
   0x8   :  { %17 = vsyncpa [#allocation9], 0 }
   0x9   :  { %18 = vsyncpa [#allocation4], 0 }
   0xa   :  { %20 = vsyncpa [#allocation4 + $0x1], 0  ;;  %s1107_s21 = smov 0   ;;  %s1109_s22 = smov 0  }
   0xb   :  { %s1111_s23 = smov 0   ;;  %s1113_s24 = smov 0  }
   0xc   :  { %s1115_s25 = smov 0   ;;  %s1117_s26 = smov 0  }
   0xd LB: > { %1339 = sst [smem:[#allocation16_spill]] %s1049_s23  ;;  %s1138_s27 = sadd.s32 4294967295, %s1061_s26   ;;  %s1061_s26 = sphi %s1117_s26, %s26_s26   ;;  %s1057_s25 = sphi %s1115_s25, %s1364_s25   ;;  %s1053_s24 = sphi %s1113_s24, %s1363_s24   ;;  %s1049_s23 = sphi %s1111_s23, %s1359_s23   ;;  %s1045_s22 = sphi %s1109_s22, %s1362_s22   ;;  %s1041_s21 = sphi %s1107_s21, %s1361_s21  }
   0xe   : > { %s715_s28 = sadd.s32 4294967294, %s1061_s26   ;;  %p60_p0 = scmp.ne.s32.totalorder %s1045_s22, %s1041_s21 }
   0xf   : > { %p1333_p1 = scmp.eq.s32.totalorder %s1138_s27, 0  ;;  %p212_p3 = scmp.eq.s32.totalorder %s715_s28, 1 }
  0x10   : > { %p716_p5 = scmp.ge.s32.totalorder %s1061_s26, 1  ;;  %p219_p7 = scmp.lt.s32.totalorder %s1061_s26, 3 }
  0x11   : > { %p1147_p4 = por %p1333_p1, %p60_p0  ;;  %p1152_p6 = por %p212_p3, %p60_p0 }
  0x12   : > { %p1157_p8 = pnand %p716_p5, %p219_p7  ;;  %s1063_s8 = smov [#allocation7]  }
  0x13   : > { %s1341_s30 = scalar_select %p1152_p6, 1, 0 }
  0x14   : > { %s231_s9 = sshll.u32 %s1063_s8, 4  ;;  %p783_p9 = pneg %p1157_p8  ;;  %s232_s9 = int_to_ptr.vmem [resolvable:$true] %s231_s9 }
  0x15   : > { %s1064_s11 = smov [#allocation8]   ;;  %s872_s13 = scalar_lea.vmem %s232_s9, 512 }
  0x16   : > { %p1166_p11 = pnand %p783_p9, %p1333_p1  ;;  %s244_s12 = sshll.u32 %s1064_s11, 4  ;;  %s245_s12 = int_to_ptr.vmem [resolvable:$true] %s244_s12 }
  0x17   : > { %p873_p13 = scmp.ne.s32.totalorder %s232_s9, %s872_s13  ;;  %p880_p5 = scmp.lt.s32.totalorder %s232_s9, %s232_s9 }
  0x18   : > { %p863_p12 = pneg %p1166_p11  ;;  %p881_p7 = scmp.lt.s32.totalorder %s872_s13, %s872_s13 }
  0x1a   : > { %p875_p0 = pnand %p873_p13, %p863_p12  ;;  %p882_p10 = por %p881_p7, %p880_p5 }
  0x1c   : > { %p876_p3 = pneg %p875_p0 }
  0x1e   : > { %p883_p9 = pnand %p882_p10, %p876_p3 }
  0x20   : > { %886 = shalt.err (!%p883_p9)
}
  0x21   : > { %s1065_s14 = smov 128   ;;  %s1066_s15 = smov 8  }
  0x22   : > { %s1344_s4 = sld [smem:[#allocation20_spill]]  ;;  %s898_s18 = scalar_lea.vmem %s245_s12, 512 }
  0x23   : > { %p899_p1 = scmp.ne.s32.totalorder %s245_s12, %s898_s18  ;;  %p906_p2 = scmp.lt.s32.totalorder %s245_s12, %s245_s12 }
  0x24   : > { %p907_p6 = scmp.lt.s32.totalorder %s898_s18, %s898_s18 }
  0x25   : > { %p901_p13 = pnand %p899_p1, %p863_p12 }
  0x26   : > { %p908_p5 = por %p907_p6, %p906_p2 }
  0x27   : > { %p902_p0 = pneg %p901_p13 }
  0x28   : > { %786 = dma.hbm_to_vmem [thread:$0]  (!%p1166_p11), %s1344_s4, 512, %s232_s9, [#allocation6], %s1065_s14, %s1065_s14, %s1066_s15  }
  0x29   : > { %p909_p10 = pnand %p908_p5, %p902_p0 }
  0x2b   : > { %912 = shalt.err (!%p909_p10)
}
  0x2c   : > { %s1345_s5 = sld [smem:[#allocation21_spill]]  ;;  %s38_s28 = sadd.s32 1, %s1057_s25 }
  0x2d   : > { %s47_s8 = sadd.s32 1, %s1049_s23  ;;  %p40_p1 = scmp.ge.s32.totalorder %s38_s28, 2 }
  0x2e   : > { %p54_p2 = scmp.ne.s32.totalorder %s1049_s23, %s1045_s22  ;;  %p55_p6 = scmp.eq.s32.totalorder %s1061_s26, 0 }
  0x2f   : > { %p803_p12 = scmp.lt.s32.totalorder %s1061_s26, 2  ;;  %s1366_s28 = smov (%p40_p1, %s38_s28), 0 }
  0x30   : > { %1346 = sst [smem:[#allocation17_spill]] %s1366_s28  ;;  %p56_p3 = por %p55_p6, %p54_p2 }
  0x31   : > { %p1347_p7 = scmp.eq.s32.totalorder %s1138_s27, 1  ;;  %s42_s10 = ssub.s32 %s1057_s25, %s1366_s28 }
  0x32   : > { %789 = dma.hbm_to_vmem [thread:$0]  (!%p1166_p11), %s1345_s5, 512, %s245_s12, [#allocation9], %s1065_s14, %s1065_s14, %s1066_s15  }
  0x33   : > { %p1198_p9 = por %p1347_p7, %p54_p2  ;;  %s1205_s11 = sand.u32 1, %s1049_s23  }
  0x34   : > { %p45_p11 = scmp.eq.s32.totalorder %s42_s10, 0  ;;  %s720_s12 = sshll.u32 %s1205_s11, 3 }
  0x35   : > { %s721_s13 = sshll.u32 %s1057_s25, 7  ;;  %s1350_s0 = sld [smem:[#allocation19_spill]] }
  0x36   : > { %s1210_s14 = scalar_select %p45_p11, %s1049_s23, %s47_s8  }
  0x37   : > { %s262_s18 = scalar_lea.vmem [#allocation2], %s720_s12  ;;  %p1217_p13 = pnand %p803_p12, %p56_p3 }
  0x38   : > { %1349 = sst [smem:[#allocation18_spill]] %s1210_s14  ;;  %s270_s19 = sshll.u32 %s262_s18, 4  ;;  %s271_s19 = int_to_ptr.vmem [resolvable:$true] %s270_s19 }
  0x39   : > { %s277_s4 = sand.u32 1, %s1061_s26   ;;  %s259_s10 = scalar_lea.sflag [#allocation3], %s1205_s11 }
  0x3a   : > { %p915_p0 = pneg %p1217_p13  ;;  %s926_s8 = scalar_lea.vmem %s271_s19, 128 }
  0x3b   : > { %s268_s17 = scalar_lea.hbm %s1350_s0, %s721_s13  ;;  %p927_p5 = scmp.ne.s32.totalorder %s271_s19, %s926_s8 }
  0x3c   : > { %s1067_s12 = smov [#allocation2]  }
  0x3d   : > { %p929_p10 = pnand %p927_p5, %p915_p0  ;;  %s931_s13 = sshll.u32 %s1067_s12, 4  ;;  %s932_s13 = int_to_ptr.vmem [resolvable:$false] %s931_s13 }
  0x3e   : > { %s933_s15 = scalar_lea.vmem %s932_s13, 256  ;;  %p934_p2 = scmp.lt.s32.totalorder %s271_s19, %s932_s13 }
  0x3f   : > { %p930_p1 = pneg %p929_p10  ;;  %p935_p6 = scmp.lt.s32.totalorder %s933_s15, %s926_s8 }
  0x41   : > { %p936_p12 = por %p935_p6, %p934_p2 }
  0x43   : > { %p937_p3 = pnand %p936_p12, %p930_p1 }
  0x45   : > { %940 = shalt.err (!%p937_p3)
}
  0x46   : > { %793 = dma.hbm_to_vmem [thread:$0]  (!%p1217_p13), %s268_s17, 128, %s271_s19, %s259_s10  }
  0x47   : > { %s722_s16 = sshll.u32 %s1057_s25, 4  ;;  %s280_s28 = scalar_lea.vmem [#allocation5], %s1205_s11 }
  0x48   : > { %s285_s5 = scalar_lea.hbm %s1327_s1, %s722_s16  ;;  %s287_s12 = sshll.u32 %s280_s28, 4  ;;  %s288_s12 = int_to_ptr.vmem [resolvable:$true] %s287_s12 }
  0x49   : > { %s278_s14 = scalar_lea.sflag [#allocation6], %s277_s4  ;;  %s954_s13 = scalar_lea.vmem %s288_s12, 16 }
  0x4a   : > { %p955_p7 = scmp.ne.s32.totalorder %s288_s12, %s954_s13  ;;  %s1068_s8 = smov [#allocation5]  }
  0x4b   : > { %s959_s15 = sshll.u32 %s1068_s8, 4  ;;  %s960_s15 = int_to_ptr.vmem [resolvable:$false] %s959_s15 }
  0x4c   : > { %p957_p11 = pnand %p955_p7, %p915_p0  ;;  %s961_s23 = scalar_lea.vmem %s960_s15, 32 }
  0x4d   : > { %p962_p10 = scmp.lt.s32.totalorder %s288_s12, %s960_s15  ;;  %p963_p1 = scmp.lt.s32.totalorder %s961_s23, %s954_s13 }
  0x4e   : > { %p958_p5 = pneg %p957_p11 }
  0x4f   : > { %p964_p2 = por %p963_p1, %p962_p10 }
  0x51   : > { %p965_p6 = pnand %p964_p2, %p958_p5 }
  0x53   : > { %968 = shalt.err (!%p965_p6)
}
  0x54   : > { %796 = dma.hbm_to_vmem [thread:$0]  (!%p1217_p13), %s285_s5, 16, %s288_s12, %s278_s14  }
  0x55   : > { %308 = sbr.rel (%p1157_p8) target bundleno = 519 (0x207), region = 44  ;;  %s1243_s0 = sand.u32 (!%p1157_p8), 1, %s1045_s22  }
  0x56   : > { %s724_s4 = sshll.u32 (!%p1157_p8), %s1243_s0, 3  ;;  %s311_s28 = scalar_lea.sflag (!%p1157_p8), [#allocation3], %s1243_s0 }
  0x57   : > { %s314_s23 = scalar_lea.vmem (!%p1157_p8), [#allocation2], %s724_s4 }
  0x5a   : > { %1020 = dma.done.wait (%p1147_p4), %s311_s28, 128  }
  0x5b   : > { %1022 = vsyncadd (%p1147_p4), %s311_s28, 4294967168  ;;  %s319_s5 = sand.u32 1, %s1138_s27   ;;  %s322_s11 = scalar_lea.vmem [#allocation5], %s1243_s0 }
  0x5c   : > { %s320_s7 = scalar_lea.sflag [#allocation6], %s319_s5 }
  0x5d   : > { %1024 = dma.done.wait (%p1147_p4), %s320_s7, 16  }
  0x5e   : > { %1026 = vsyncadd (%p1147_p4), %s320_s7, 4294967280  ;;  %p1352_p8 = scmp.eq.s32.totalorder %s1138_s27, 0 }
  0x60   : > { %1028 = dma.done.wait (%p1352_p8), [#allocation6], 512   ;;  %p1353_p13 = pmov %p1352_p8 }
  0x61   : > { %p1354_p0 = pmov %p1352_p8 }
  0x62   : > { %1030 = vsyncadd (%p1353_p13), [#allocation6], 4294966784 }
  0x63   : > { %1032 = dma.done.wait (%p1354_p0), [#allocation9], 512   ;;  %p1355_p12 = pmov %p1354_p0 }
  0x64   : > { %v1069_v0 = vmov 0.0   ;;  %vm1070_vm0 = vmmov 0   ;;  %v379_v1 = vld [vmem:[#allocation7 + $0x18] sm:$0xff]  ;;  %v378_v2 = vld [vmem:[#allocation7 + $0x10] sm:$0xff]  ;;  %v728_v4 = vld [vmem:[%s322_s11] ss:$0 sm:$0xff] }
  0x65   : > { %1034 = vsyncadd (%p1355_p12), [#allocation9], 4294966784  ;;  %747 = vmatprep.subr.mxu0 %v1069_v0  ;;  %755 = vmatprep.mubr.msk.f32.mxu0 %vm1070_vm0, %v1069_v0  ;;  %v375_v3 = vld [vmem:[%s314_s23] sm:$0xff]  ;;  %v376_v7 = vld [vmem:[#allocation7] sm:$0xff]  ;;  %vm392_vm1 = vcmask 261120   ;;  %p369_p4 = scmp.lt.s32.totalorder %s1053_s24, 1 }
  0x66   : > { %758 = vmatprep.subr.mxu1 %v1069_v0  ;;  %766 = vmatprep.mubr.msk.f32.mxu1 %vm1070_vm0, %v1069_v0  ;;  %v377_v5 = vld [vmem:[#allocation7 + $0x8] sm:$0xff]  ;;  %v383_v6 = vld [vmem:[#allocation8 + $0x18] sm:$0xff]  ;;  %v391_v8 = vmul.f32 %v728_v4, %v375_v3  ;;  %v382_v9 = vld [vmem:[#allocation8 + $0x10] sm:$0xff]  ;;  %s734_s16 = sshll.u32 %s1053_s24, 7  ;;  %s368_s18 = scalar_lea.vmem [#allocation10], %s724_s4 }
  0x67   : > { %748 = vmatpush3.msra.mxu0 %v379_v1  ;;  %759 = vmatpush3.msra.mxu1 %v383_v6  ;;  %v381_v10 = vld [vmem:[#allocation8 + $0x8] sm:$0xff]  ;;  %v380_v11 = vld [vmem:[#allocation8] sm:$0xff]  ;;  %s370_s27 = scalar_select %p369_p4, %s1053_s24, 1 }
  0x68   : > { %749 = vmatprep.subr.mxu0 %v1069_v0  ;;  %760 = vmatprep.subr.mxu1 %v1069_v0  ;;  %s577_s12 = sshll.u32 %s368_s18, 4  ;;  %s1283_s15 = scalar_lea.hbm %s1332_s6, %s734_s16  ;;  %s578_s12 = int_to_ptr.vmem [resolvable:$true] %s577_s12 }
  0x69   : > { %750 = vmatpush3.msra.mxu0 %v378_v2  ;;  %761 = vmatpush3.msra.mxu1 %v382_v9  ;;  %s371_s17 = scalar_lea.vmem %s1328_s2, %s370_s27  ;;  %s374_s10 = scalar_lea.vmem %s1329_s3, %s370_s27 }
  0x6a   : > { %751 = vmatprep.subr.mxu0 %v1069_v0  ;;  %762 = vmatprep.subr.mxu1 %v1069_v0  ;;  %v730_v14 = vld [vmem:[%s371_s17] ss:$0 sm:$0xff]  ;;  %s563_s28 = scalar_lea.sflag [#allocation4], %s1243_s0  ;;  %s969_s23 = scalar_lea.vmem %s578_s12, 128 }
  0x6b   : > { %752 = vmatpush3.msra.mxu0 %v377_v5  ;;  %763 = vmatpush3.msra.mxu1 %v381_v10  ;;  %v732_v18 = vld [vmem:[%s374_s10] ss:$0 sm:$0xff]  ;;  %p970_p3 = scmp.ne.s32.totalorder %s578_s12, %s969_s23  ;;  %s1071_s24 = smov [#allocation10]  }
  0x6c   : > { %753 = vmatprep.subr.mxu0 %v1069_v0  ;;  %764 = vmatprep.subr.mxu1 %v1069_v0  ;;  %s973_s4 = sshll.u32 %s1071_s24, 4  ;;  %s974_s4 = int_to_ptr.vmem [resolvable:$false] %s973_s4 }
  0x6d   : > { %754 = vmatpush3.msra.mxu0 %v376_v7  ;;  %765 = vmatpush3.msra.mxu1 %v380_v11  ;;  %p971_p7 = pnand %p970_p3, %p1198_p9  ;;  %s975_s5 = scalar_lea.vmem %s974_s4, 256 }
  0x6e   : > { %756 = vmatmul.mubr.msk.f32.vlgmr.msra.gmra.mxu0 %vm392_vm1, %v391_v8  ;;  %p976_p5 = scmp.lt.s32.totalorder %s578_s12, %s974_s4  ;;  %p977_p10 = scmp.lt.s32.totalorder %s975_s5, %s969_s23 }
  0x6f   : > { %p972_p11 = pneg %p971_p7 }
  0x70   : > { %p978_p1 = por %p977_p10, %p976_p5 }
  0x72   : > { %p979_p2 = pnand %p978_p1, %p972_p11 }
 0x12e   : > { %v462_v12 = vpop.f32.mrf.mxu0 }
 0x12f   : > { %vm466_vm2 = vcmp.ge.f32.partialorder %v462_v12, 0.0  ;;  %v467_v13 = vmul.f32 0.2, %v462_v12 }
 0x130   : > { %v757_v15 = vpop.f32.mrf.mxu0 }
 0x131   : > { %v468_v16 = vsel %vm466_vm2, %v462_v12, %v467_v13 }
 0x132   : > { %v476_v17 = vmul.f32 %v730_v14, %v468_v16 }
 0x134   : > { %767 = vmatmul.mubr.msk.f32.vlgmr.msra.gmra.mxu1 %vm392_vm1, %v476_v17 }
 0x1f4   : > { %v546_v19 = vpop.f32.mrf.mxu1 }
 0x1f5   : > { %v557_v20 = vmul.f32 %v732_v18, %v546_v19 }
 0x1f6   : > { %v768_v21 = vpop.f32.mrf.mxu1 }
 0x1f7   : > { %vm558_vm3 = vcmp.ge.f32.partialorder %v557_v20, 0.0  ;;  %v559_v22 = vmul.f32 0.2, %v557_v20 }
 0x1f9   : > { %v560_v23 = vsel %vm558_vm3, %v557_v20, %v559_v22 }
 0x1fa   : > { %561 = vst.msk [vmem:[%s368_s18] sm:$0xff] %vm392_vm1, %v560_v23 }
 0x1fb   : > { %982 = shalt.err (!%p979_p2)
}
 0x1fc   : > { %s983_s7 = scalar_lea.hbm %s1283_s15, 128  ;;  %s987_s27 = scalar_lea.hbm %s1332_s6, 256 }
 0x1fd   : > { %p984_p6 = scmp.ne.s32.totalorder %s1283_s15, %s983_s7  ;;  %p988_p0 = scmp.lt.s32.totalorder %s1283_s15, %s1332_s6 }
 0x1fe   : > { %p989_p12 = scmp.lt.s32.totalorder %s987_s27, %s983_s7 }
 0x1ff   : > { %p985_p8 = pnand %p984_p6, %p1198_p9 }
 0x200   : > { %p990_p4 = por %p989_p12, %p988_p0 }
 0x201   : > { %p986_p13 = pneg %p985_p8 }
 0x203   : > { %p991_p3 = pnand %p990_p4, %p986_p13 }
 0x205   : > { %994 = shalt.err (!%p991_p3)
}
 0x206   : > { %781 = dma.vmem_to_hbm [thread:$0]  (%p1198_p9), %s578_s12, 128, %s1283_s15, %s563_s28  }
 0x207 PF: > { %s589_s17 = sand.u32 1, %s1041_s21   ;;  %p1356_p7 = scmp.ne.s32.totalorder %s1341_s30, 0 }
 0x208   : > { %p1357_p11 = scmp.ge.s32.totalorder %s1061_s26, 2  ;;  %s590_s19 = scalar_lea.sflag [#allocation4], %s589_s17 }
 0x20a   : > { %p798_p5 = pnand %p1357_p11, %p1356_p7 }
 0x20c   : > { %p799_p10 = pneg %p798_p5 }
 0x20e   : > { %1036 = dma.done.wait (%p799_p10), %s590_s19, 128  }
 0x20f   : > { %1038 = vsyncadd (%p799_p10), %s590_s19, 4294967168  ;;  %s26_s26 = sadd.s32 1, %s1061_s26   ;;  %s1358_s20 = sld [smem:[#allocation16_spill]] }
 0x210   : > { %p23_p1 = scmp.ge.s32.totalorder %s26_s26, 4   ;;  %s1359_s23 = sld [smem:[#allocation18_spill]] }
 0x211   : > { %s1360_s9 = sld [smem:[#allocation17_spill]]  ;;  %s1361_s21 = smov %s1045_s22 }
 0x212   : > { %s1363_s24 = smov %s1057_s25 }
 0x213   :  { %25 = sbr.rel (!%p23_p1) target bundleno = 13 (0xd), region = 116 }
 0x215   : > { %s1362_s22 = smov %s1358_s20 }
 0x217   : > { %s1364_s25 = smov %s1360_s9 }
 0x218   :  { %595 = vsyncpa [#allocation3], 1 }
 0x219   :  { %597 = vsyncpa [#allocation3 + $0x1], 1 }
 0x21a   :  { %598 = vsyncpa [#allocation6], 1 }
 0x21b   :  { %600 = vsyncpa [#allocation6 + $0x1], 1 }
 0x21c   :  { %601 = vsyncpa [#allocation9], 1 }
 0x21d   :  { %602 = vsyncpa [#allocation4], 1 }
 0x21e   :  { %604 = vsyncpa [#allocation4 + $0x1], 1 }

</bundles_post_ra>
